<compile_context>
chip_gen: v7x
topology: tpu7x:2x2x1
jax: 0.10.0
libtpu: 0.0.40
codegen_flags: <defaults>
</compile_context>

<pallas_src>
import jax
import jax.numpy as jnp
from jax.experimental import pallas as pl
from jax.experimental.pallas import tpu as pltpu


def _scale_kernel(w_ref, x_ref, o_ref):
    # w_ref: (TR, 1) float32 per-row scale; x_ref/o_ref: (TR, TC) lane-dense.
    # Compute in the promoted (float32) type, cast only the result.
    o_ref[...] = (w_ref[...] * x_ref[...]).astype(o_ref.dtype)


def _round_up(v, m):
    return (v + m - 1) // m * m


# Dtype-aware sublane granularity (rows per packed vreg group).
_SUBLANE = {4: 8, 2: 16, 1: 32}
_LANE = 128


def _vmem_capacity_bytes():
    """Physical VMEM per TensorCore, with safe fallbacks."""
    try:
        info = pltpu.get_tpu_info()
        cap = getattr(info, "vmem_capacity_bytes", None)
        if cap:
            return int(cap)
    except Exception:
        pass
    try:
        kind = jax.devices()[0].device_kind.lower()
        if "v7" in kind:
            return 64 << 20   # v7x: 64 MiB per TC
        return 128 << 20      # v5e / v6e
    except Exception:
        pass
    return 64 << 20           # conservative default


def _choose_tiles(R, S, itemsize, block_cap_bytes):
    """Pick (TR, TC) so blocks stream large, stay in budget, need no padding."""
    sub = _SUBLANE.get(itemsize, 8)
    max_elems = block_cap_bytes // itemsize
    s_vmem = _round_up(S, _LANE)  # VMEM footprint (lanes) of one full row

    if s_vmem * sub <= max_elems:
        # Full spatial row per block (widest stores, spatial axis un-blocked;
        # full-extent last dim is legal even when S is not 128-divisible).
        TC = S
        rows = max(sub, (max_elems // s_vmem) // sub * sub)
        TR = min(_round_up(R, sub), rows)
    else:
        # A single spatial row exceeds the budget: minimal rows, go wide with
        # a 128-multiple TC; ragged tail handled by the cdiv grid.
        TR = sub
        TC = min(s_vmem, max(_LANE, (max_elems // sub) // _LANE * _LANE))

    # Keep at least two grid blocks overall when possible so the "parallel"
    # axes can shard across both TensorCores on v7x and the DMA pipeline has
    # something to overlap.  Count TOTAL blocks (rows x spatial) first so we
    # do not needlessly shrink TR when the spatial axis already splits.
    row_blocks = -(-R // TR)
    col_blocks = -(-S // TC)
    if row_blocks * col_blocks < 2:
        half = _round_up((R + 1) // 2, sub)
        if sub <= half < TR:
            TR = half

    # Full-extent row block when it covers everything anyway (no boundary
    # masking needed, always legal).
    if TR >= R:
        TR = R
    return TR, TC


def scale_module_forward(x_nchw, weight, *, min_pallas_bytes=256 * 1024):
    """y = weight * x with weight shaped (1, C, 1, 1), broadcast over N/H/W."""
    N, C, H, W = x_nchw.shape
    dtype = x_nchw.dtype
    itemsize = jnp.dtype(dtype).itemsize

    # KB-scale tensors: a standalone pallas_call costs more than the copy and
    # blocks XLA fusion with neighbors -- use a plain broadcast multiply.
    # Keep the scale in float32 so low-precision dtypes don't truncate it.
    if x_nchw.size * itemsize < min_pallas_bytes:
        w_f32 = weight.astype(jnp.float32).reshape(1, C, 1, 1)
        return (w_f32 * x_nchw).astype(dtype)

    R = N * C          # rows    -> sublane axis
    S = H * W          # spatial -> lane axis

    x2d = x_nchw.reshape(R, S)
    # Tiny (R, 1) float32 per-row scale (negligible HBM vs x).
    w_row = jnp.broadcast_to(
        weight.astype(jnp.float32).reshape(1, C), (N, C)
    ).reshape(R, 1)

    # Generation-aware VMEM budget: leave headroom under physical capacity and
    # size blocks so double-buffered x + out (+ weight, internal scratch) fit.
    vmem_cap = _vmem_capacity_bytes()
    vmem_limit = min((vmem_cap * 3) // 4, 96 << 20)   # v7x: 48 MiB, v5e/v6e: 96 MiB
    block_cap = max(2 << 20, min(16 << 20, vmem_limit // 6))

    TR, TC = _choose_tiles(R, S, itemsize, block_cap)
    grid = (-(-R // TR), -(-S // TC))   # cdiv; boundary blocks masked, no padding

    cost = pl.CostEstimate(
        flops=R * S,
        transcendentals=0,
        bytes_accessed=2 * R * S * itemsize + R * 4,
    )

    out2d = pl.pallas_call(
        _scale_kernel,
        out_shape=jax.ShapeDtypeStruct((R, S), dtype),
        grid_spec=pltpu.PrefetchScalarGridSpec(
            num_scalar_prefetch=0,
            grid=grid,
            in_specs=[
                # Per-row scale: block index depends only on i; with j as the
                # innermost grid axis the weight block is reused across
                # consecutive spatial steps.
                pl.BlockSpec((TR, 1), lambda i, j: (i, 0)),
                pl.BlockSpec((TR, TC), lambda i, j: (i, j)),
            ],
            out_specs=pl.BlockSpec((TR, TC), lambda i, j: (i, j)),
        ),
        compiler_params=pltpu.CompilerParams(
            dimension_semantics=("parallel", "parallel"),
            vmem_limit_bytes=vmem_limit,
        ),
        cost_estimate=cost,
    )(w_row, x2d)

    return out2d.reshape(N, C, H, W)


if __name__ == "__main__":
    key = jax.random.PRNGKey(0)

    # Main check: NCHW input, per-channel weight like nn.Parameter(ones * init_scale).
    N, C, H, W = 2, 4, 16, 16
    init_scale = 1.0
    weight = jnp.ones((1, C, 1, 1), dtype=jnp.float32) * init_scale
    # Perturb deterministically so the broadcast is actually exercised.
    weight = weight * (1.0 + 0.1 * jnp.arange(C, dtype=jnp.float32).reshape(1, C, 1, 1))

    x = jax.random.normal(key, (N, C, H, W), dtype=jnp.float32)

    # min_pallas_bytes=0 forces the Pallas path even at this small test size
    # (production callers keep the default bypass threshold).
    y = scale_module_forward(x, weight, min_pallas_bytes=0)
    y = jax.block_until_ready(y)

    y_ref = weight * x
    assert y.shape == (N, C, H, W)
    assert jnp.allclose(y, y_ref, atol=1e-6, rtol=1e-6)

    # Secondary check: non-(8,128)-divisible shape exercises the masked
    # boundary-block path (no padding copies anymore).
    key2 = jax.random.PRNGKey(1)
    N2, C2, H2, W2 = 2, 3, 10, 12
    w2 = 0.5 + 0.25 * jnp.arange(C2, dtype=jnp.float32).reshape(1, C2, 1, 1)
    x2 = jax.random.normal(key2, (N2, C2, H2, W2), dtype=jnp.float32)
    y2 = jax.block_until_ready(scale_module_forward(x2, w2, min_pallas_bytes=0))
    assert jnp.allclose(y2, w2 * x2, atol=1e-6, rtol=1e-6)

    # bf16 check: scale must not be truncated by a low-precision cast.
    x3 = jax.random.normal(jax.random.PRNGKey(2), (N, C, H, W), dtype=jnp.bfloat16)
    y3 = jax.block_until_ready(scale_module_forward(x3, weight, min_pallas_bytes=0))
    y3_ref = (weight * x3.astype(jnp.float32)).astype(jnp.bfloat16)
    assert jnp.allclose(y3.astype(jnp.float32), y3_ref.astype(jnp.float32),
                        atol=1e-2, rtol=1e-2)

    print("KERNEL_OK")
</pallas_src>

<mosaic_0001>
module attributes {stable_mosaic.version = 11 : i64} {
  func.func @_scale_kernel(%arg0: i32, %arg1: i32, %arg2: memref<8x1xf32, #tpu.memory_space<vmem>>, %arg3: memref<8x256xf32, #tpu.memory_space<vmem>>, %arg4: memref<8x256xf32, #tpu.memory_space<vmem>>) attributes {dimension_semantics = [#tpu.dimension_semantics<parallel>, #tpu.dimension_semantics<parallel>], iteration_bounds = array<i64: 1, 1>, scalar_prefetch = 0 : i64, scratch_operands = 0 : i64, tpu.core_type = #tpu.core_type<tc>, window_params = [{transform_indices = @transform_0, window_bounds = array<i64: 8, 1>}, {transform_indices = @transform_1, window_bounds = array<i64: 8, 256>}, {transform_indices = @transform_2, window_bounds = array<i64: 8, 256>}]} {
    %c0 = arith.constant 0 : index
    %c0_0 = arith.constant 0 : index
    %0 = vector.load %arg2[%c0, %c0_0] : memref<8x1xf32, #tpu.memory_space<vmem>>, vector<8x1xf32>
    %c0_1 = arith.constant 0 : index
    %c0_2 = arith.constant 0 : index
    %1 = vector.load %arg3[%c0_1, %c0_2] : memref<8x256xf32, #tpu.memory_space<vmem>>, vector<8x256xf32>
    %2 = vector.broadcast %0 : vector<8x1xf32> to vector<8x256xf32>
    %3 = arith.mulf %2, %1 : vector<8x256xf32>
    %c0_3 = arith.constant 0 : index
    %c0_4 = arith.constant 0 : index
    %4 = vector.load %arg4[%c0_3, %c0_4] : memref<8x256xf32, #tpu.memory_space<vmem>>, vector<8x256xf32>
    tpu.vector_store %arg4[%c0_3, %c0_4], %3 {strides = array<i32>} : memref<8x256xf32, #tpu.memory_space<vmem>>, vector<8x256xf32>,
    return
  }
  func.func @transform_0(%arg0: i32, %arg1: i32) -> (i32, i32) {
    %c0_i32 = arith.constant 0 : i32
    %c0_i32_0 = arith.constant 0 : i32
    return %arg0, %c0_i32 : i32, i32
  }
  func.func @transform_1(%arg0: i32, %arg1: i32) -> (i32, i32) {
    %c0_i32 = arith.constant 0 : i32
    return %arg0, %arg1 : i32, i32
  }
  func.func @transform_2(%arg0: i32, %arg1: i32) -> (i32, i32) {
    %c0_i32 = arith.constant 0 : i32
    return %arg0, %arg1 : i32, i32
  }
}

</mosaic_0001>

<bundles_post_ra>
// kernel: tpu_custom_call.1
= control target key start
LH: loop header
LB: loop body
LE: loop exit
PB: predicated region body
PF: predicated region fallthrough
CT: control target
= control target key end

     0   :  { %7 = vsyncpa [#allocation3], 0  ;;  %s196_s0 = inlined_call_operand.hbm [shape: f32[8,1], index: 0, kind: input, shape index: {}]   ;;  %s197_s1 = inlined_call_operand.hbm [shape: f32[8,256], index: 1, kind: input, shape index: {}]   ;;  %s198_s2 = inlined_call_operand.hbm [shape: f32[8,256], index: 2, kind: output, shape index: {}]  }
   0x1   :  { %8 = vsyncpa [#allocation6], 0 }
   0x2   :  { %9 = vsyncpa [#allocation4], 0  ;;  %s141_s9 = smov [#allocation2]   ;;  %s142_s11 = smov [#allocation5]  }
   0x3   :  { %s16_s10 = sshll.u32 %s141_s9, 4  ;;  %s26_s12 = sshll.u32 %s142_s11, 4  ;;  %s17_s10 = int_to_ptr.vmem [resolvable:$true] %s16_s10  ;;  %s27_s12 = int_to_ptr.vmem [resolvable:$true] %s26_s12 }
   0x4   :  { %s69_s15 = scalar_lea.hbm %s196_s0, 128 }
   0x5   :  { %p70_p0 = scmp.ne.s32.totalorder %s196_s0, %s69_s15  ;;  %p73_p1 = scmp.lt.u32.totalorder %s69_s15, %s196_s0 }
   0x7   :  { %p75_p2 = pnand %p73_p1, %p70_p0 }
   0x9   :  { %78 = shalt.err (!%p75_p2)
}
   0xa   :  { %s79_s20 = scalar_lea.vmem %s17_s10, 128  ;;  %p84_p4 = scmp.lt.s32.totalorder %s17_s10, %s17_s10 }
   0xb   :  { %p80_p3 = scmp.ne.s32.totalorder %s17_s10, %s79_s20  ;;  %p85_p5 = scmp.lt.s32.totalorder %s79_s20, %s79_s20 }
   0xd   :  { %p86_p6 = por %p85_p5, %p84_p4 }
   0xf   :  { %p87_p7 = pnand %p86_p6, %p80_p3 }
  0x11   :  { %90 = shalt.err (!%p87_p7)
}
  0x12   :  { %19 = dma.hbm_to_vmem [thread:$0]  %s196_s0, 128, %s17_s10, [#allocation3]  }
  0x13   :  { %s91_s25 = scalar_lea.hbm %s197_s1, 256 }
  0x14   :  { %p92_p8 = scmp.ne.s32.totalorder %s197_s1, %s91_s25  ;;  %p95_p9 = scmp.lt.u32.totalorder %s91_s25, %s197_s1 }
  0x16   :  { %p97_p10 = pnand %p95_p9, %p92_p8 }
  0x18   :  { %100 = shalt.err (!%p97_p10)
}
  0x19   :  { %s101_s30 = scalar_lea.vmem %s27_s12, 256  ;;  %p106_p12 = scmp.lt.s32.totalorder %s27_s12, %s27_s12 }
  0x1a   :  { %p102_p11 = scmp.ne.s32.totalorder %s27_s12, %s101_s30  ;;  %p107_p13 = scmp.lt.s32.totalorder %s101_s30, %s101_s30 }
  0x1c   :  { %p108_p0 = por %p107_p13, %p106_p12 }
  0x1e   :  { %p109_p1 = pnand %p108_p0, %p102_p11 }
  0x20   :  { %112 = shalt.err (!%p109_p1)
}
  0x21   :  { %29 = dma.hbm_to_vmem [thread:$0]  %s197_s1, 256, %s27_s12, [#allocation6]  }
  0x22   :  { %135 = dma.done.wait [#allocation3], 128  }
  0x23   :  { %136 = vsyncadd [#allocation3], 4294967168 }
  0x24   :  { %137 = dma.done.wait [#allocation6], 256  }
  0x25   :  { %138 = vsyncadd [#allocation6], 4294967040  ;;  %v143_v0 = vmov 0   ;;  %v36_v1 = vld [vmem:[#allocation2] sm:$0xff]  ;;  %v37_v2 = vld [vmem:[#allocation5] sm:$0xff]  ;;  %s144_s4 = smov [#allocation7]  }
  0x26   :  { %68 = vset.pattern.permute.xlu0 %v143_v0  ;;  %v38_v3 = vld [vmem:[#allocation5 + $0x8] sm:$0xff]  ;;  %s54_s5 = sshll.u32 %s144_s4, 4  ;;  %s55_s5 = int_to_ptr.vmem [resolvable:$true] %s54_s5 }
  0x27   :  { %41 = vperm.xlu0 %68, %v36_v1   ;;  %s113_s6 = scalar_lea.vmem %s55_s5, 256  ;;  %p118_p3 = scmp.lt.s32.totalorder %s55_s5, %s55_s5 }
  0x28   :  { %p114_p2 = scmp.ne.s32.totalorder %s55_s5, %s113_s6  ;;  %p119_p4 = scmp.lt.s32.totalorder %s113_s6, %s113_s6 }
  0x2a   :  { %p120_p5 = por %p119_p4, %p118_p3 }
  0x2c   :  { %p121_p6 = pnand %p120_p5, %p114_p2 }
  0xa6   :  { %v42_v4 = vpop.permute.xlu0 %41 }
  0xa7   :  { %v44_v5 = vmul.f32 %v42_v4, %v37_v2  ;;  %v45_v6 = vmul.f32 %v42_v4, %v38_v3 }
  0xa9   :  { %46 = vst [vmem:[#allocation7] sm:$0xff] %v44_v5  ;;  %47 = vst [vmem:[#allocation7 + $0x8] sm:$0xff] %v45_v6 }
  0xaa   :  { %124 = shalt.err (!%p121_p6)
}
  0xab   :  { %s125_s8 = scalar_lea.hbm %s198_s2, 256 }
  0xac   :  { %p126_p7 = scmp.ne.s32.totalorder %s198_s2, %s125_s8  ;;  %p129_p8 = scmp.lt.u32.totalorder %s125_s8, %s198_s2 }
  0xae   :  { %p131_p9 = pnand %p129_p8, %p126_p7 }
  0xb0   :  { %134 = shalt.err (!%p131_p9)
}
  0xb1   :  { %57 = dma.vmem_to_hbm [thread:$0]  %s55_s5, 256, %s198_s2, [#allocation4]  }
  0xb2   :  { %139 = dma.done.wait [#allocation4], 256  }
  0xb3   :  { %140 = vsyncadd [#allocation4], 4294967040 }
  0xb4   :  { %61 = vsyncpa [#allocation3], 1 }
  0xb5   :  { %62 = vsyncpa [#allocation6], 1 }
  0xb6   :  { %63 = vsyncpa [#allocation4], 1 }

</bundles_post_ra>
